<compile_context>
chip_gen: v7x
topology: tpu7x:2x2x1
jax: 0.10.0
libtpu: 0.0.40
codegen_flags: <defaults>
</compile_context>

<pallas_src>
import functools

import jax
import jax.numpy as jnp
from jax.experimental import pallas as pl
from jax.experimental.pallas import tpu as pltpu


_TM_CAP = 512                       # max rows per x tile
_TK_CAP = 4096                      # max K columns per x tile
_VMEM_TARGET = 28 * 1024 * 1024     # tile-selection budget (fits every gen)
_W_RESIDENT_MAX_BYTES = 4 * 1024 * 1024
_FAST_PATH_ELEMS = 1 << 17          # below this many x elements: plain XLA


def _round_up(v, m):
    return ((v + m - 1) // m) * m


def _best_128_divisor(n_pad, cap):
    """Largest multiple-of-128 divisor of n_pad that is <= cap (or None)."""
    t = (min(cap, n_pad) // 128) * 128
    while t >= 128:
        if n_pad % t == 0:
            return t
        t -= 128
    return None


# ---------------------------------------------------------------------------
# Kernels
# ---------------------------------------------------------------------------
def _gemv_single_kernel(x_ref, w_ref, o_ref):
    # Whole K in one tile: no accumulator, no predicated init/finalize.
    #   x_ref: (TM, Dp) input rows
    #   w_ref: (1, Dp)  full weight row (VMEM resident)
    #   o_ref: (1, TM)  lane-dense output tile
    # dot_general contracts the shared K dim of w and x -> (1, TM) directly,
    # feeding native-dtype operands to the MXU with f32 accumulation.
    o_ref[...] = jax.lax.dot_general(
        w_ref[...], x_ref[...],
        dimension_numbers=(((1,), (1,)), ((), ())),
        preferred_element_type=jnp.float32,
    ).astype(o_ref.dtype)


def _gemv_ktiled_kernel(x_ref, w_ref, o_ref, acc_ref, *, tk, w_resident):
    # K-tiled GEMV with an f32 resident accumulator.
    # NOTE: the init/finalize logic below assumes the K (reduction) axis is the
    # LAST, fastest-varying grid axis. Do not reorder the grid.
    k = pl.program_id(1)

    @pl.when(k == 0)
    def _init():
        acc_ref[...] = jnp.zeros_like(acc_ref)

    if w_resident:
        # Weight row lives in VMEM for the whole kernel; slice the K window.
        w_tile = w_ref[:, pl.ds(pl.multiple_of(k * tk, 128), tk)]
    else:
        w_tile = w_ref[...]

    acc_ref[...] += jax.lax.dot_general(
        w_tile, x_ref[...],
        dimension_numbers=(((1,), (1,)), ((), ())),
        preferred_element_type=jnp.float32,
    )

    @pl.when(k == pl.num_programs(1) - 1)
    def _finalize():
        o_ref[...] = acc_ref[...].astype(o_ref.dtype)


# ---------------------------------------------------------------------------
# Tiling selection (no tile-multiple over-padding)
# ---------------------------------------------------------------------------
def _pick_row_tiling(n, tm_cap):
    n_pad = _round_up(max(n, 8), 8)
    # Prefer >= 2 row tiles so the "parallel" axis can shard across both v7x
    # TensorCores; fall back to a single full-height tile (no extra padding).
    tm = _best_128_divisor(n_pad, min(tm_cap, n_pad // 2))
    if tm is None:
        tm = _best_128_divisor(n_pad, tm_cap)
    if tm is not None:
        return n_pad, tm
    if n_pad <= tm_cap:
        return n_pad, n_pad
    # Large N with no multiple-of-128 divisor: pad rows up to a multiple of
    # 128 (cheap relative to N) so the row axis can still be tiled.
    n_pad = _round_up(n, 128)
    tm = (_best_128_divisor(n_pad, min(tm_cap, n_pad // 2))
          or _best_128_divisor(n_pad, tm_cap) or 128)
    return n_pad, tm


def _pick_k_tiling(d, tm, x_isz, w_isz, tk_cap, vmem_target):
    d_pad = _round_up(d, 128)
    # Single K tile (no reduction grid axis) if the full row fits the budget.
    single_need = 2 * tm * d_pad * x_isz + 2 * d_pad * w_isz
    if single_need <= vmem_target:
        return d_pad, d_pad
    tk = _best_128_divisor(d_pad, tk_cap)
    if tk is not None and tk >= min(1024, tk_cap):
        return d_pad, tk
    # Only tiny divisors exist: pad D up to a multiple of 1024 so the K tiles
    # are reasonably sized (over-pad < 1024 columns, small for large D).
    d_pad = _round_up(d, 1024)
    for cand in (4096, 2048, 1024):
        if cand <= tk_cap and d_pad % cand == 0:
            return d_pad, cand
    return d_pad, 1024


# ---------------------------------------------------------------------------
# Forward wrapper
# ---------------------------------------------------------------------------
def linear_layer_forward(x, w, *, force_pallas=False,
                         tm_cap=_TM_CAP, tk_cap=_TK_CAP,
                         vmem_target=_VMEM_TARGET):
    """Pallas equivalent of F.linear(x, w) for a single-output weight row.

    x: (..., D), w: (1, D)  ->  (..., 1)
    """
    *lead, d = x.shape
    assert w.shape == (1, d)
    out_dtype = x.dtype
    x2 = x.reshape(-1, d)
    n = x2.shape[0]

    # Small-problem fast path: pallas_call launch + pipeline priming costs a
    # few microseconds; XLA's fused GEMV wins outright for tiny shapes.
    if not force_pallas and n * d < _FAST_PATH_ELEMS:
        return jnp.dot(x2, w.T).astype(out_dtype).reshape(*lead, 1)

    x_isz = x2.dtype.itemsize
    w_isz = w.dtype.itemsize

    n_pad, tm = _pick_row_tiling(n, tm_cap)
    d_pad, tk = _pick_k_tiling(d, tm, x_isz, w_isz, tk_cap, vmem_target)

    # Minimal 8/128 alignment padding only (tiles divide the padded shape).
    if n_pad != n or d_pad != d:
        x_p = jnp.pad(x2, ((0, n_pad - n), (0, d_pad - d)))
    else:
        x_p = x2
    w_p = w if d_pad == d else jnp.pad(w, ((0, 0), (0, d_pad - d)))

    n_rows = n_pad // tm
    single_k = (tk == d_pad)
    w_resident = (2 * d_pad * w_isz) <= _W_RESIDENT_MAX_BYTES

    bytes_accessed = (n_pad * d_pad * x_isz + d_pad * w_isz
                      + n_pad * jnp.dtype(out_dtype).itemsize)
    cost = pl.CostEstimate(flops=2 * n_pad * d_pad, transcendentals=0,
                           bytes_accessed=bytes_accessed)

    if single_k:
        grid = (n_rows,)
        in_specs = [
            pl.BlockSpec((tm, d_pad), lambda i: (i, 0)),
            pl.BlockSpec((1, d_pad), lambda i: (0, 0)),   # w: fetched once
        ]
        out_specs = pl.BlockSpec((1, tm), lambda i: (0, i))
        scratch = []
        kernel = _gemv_single_kernel
        dims = ("parallel",)
        vmem_need = (2 * tm * d_pad * x_isz + 2 * d_pad * w_isz
                     + 2 * tm * jnp.dtype(out_dtype).itemsize)
    else:
        # K (reduction) axis MUST stay the last grid axis (accumulator logic).
        grid = (n_rows, d_pad // tk)
        if w_resident:
            w_spec = pl.BlockSpec((1, d_pad), lambda i, k: (0, 0))
        else:
            w_spec = pl.BlockSpec((1, tk), lambda i, k: (0, k))
        in_specs = [
            pl.BlockSpec((tm, tk), lambda i, k: (i, k)),
            w_spec,
        ]
        # Lane-dense output, block index constant along k -> stays resident.
        out_specs = pl.BlockSpec((1, tm), lambda i, k: (0, i))
        scratch = [pltpu.VMEM((1, tm), jnp.float32)]
        kernel = functools.partial(_gemv_ktiled_kernel, tk=tk,
                                   w_resident=w_resident)
        dims = ("parallel", "arbitrary")
        vmem_need = (2 * tm * tk * x_isz
                     + 2 * (d_pad if w_resident else tk) * w_isz
                     + 2 * tm * jnp.dtype(out_dtype).itemsize
                     + tm * 4)

    # Explicit limit: covers our tiles with margin, and stays under v7x's
    # 64 MiB physical VMEM while lifting v5e's 16 MiB scoped default.
    vmem_limit = int(min(48 << 20, max(32 << 20, vmem_need + (2 << 20))))

    out = pl.pallas_call(
        kernel,
        out_shape=jax.ShapeDtypeStruct((1, n_pad), out_dtype),
        grid_spec=pltpu.PrefetchScalarGridSpec(
            num_scalar_prefetch=0,
            grid=grid,
            in_specs=in_specs,
            out_specs=out_specs,
            scratch_shapes=scratch,
        ),
        compiler_params=pltpu.CompilerParams(
            dimension_semantics=dims,
            vmem_limit_bytes=vmem_limit),
        cost_estimate=cost,
    )(x_p, w_p)

    # (1, n_pad) lane-dense result -> (..., 1) like F.linear(x, w).
    return out[0, :n].reshape(*lead, 1)


class LinearLayerPallas:
    """JAX/Pallas re-implementation of the PyTorch LinearLayer (forward only)."""

    def __init__(self, dim_in, prior_mu=0.0, prior_sig2=1.0, sig2_y=0.1, key=None):
        self.dim_in = dim_in
        self.prior_mu = prior_mu
        self.prior_sig2 = prior_sig2
        self.sig2_y = sig2_y
        if key is None:
            key = jax.random.PRNGKey(0)
        k_mu, k_w, self._key = jax.random.split(key, 3)
        # init_parameters: mu ~ N(0, 1), sig2 = prior_sig2 * I
        self.mu = jax.random.normal(k_mu, (1, dim_in), dtype=jnp.float32)
        self.sig2 = prior_sig2 * jnp.eye(dim_in, dtype=jnp.float32)
        self._chol = jnp.linalg.cholesky(self.sig2)
        # sample_weights(store=True): w ~ MVN(mu, sig2) == mu + L @ eps
        self.w = self._sample_w(k_w)

    def _sample_w(self, key):
        eps = jax.random.normal(key, (self.dim_in,), dtype=jnp.float32)
        return (self.mu.reshape(-1) + self._chol @ eps).reshape(1, self.dim_in)

    def sample_weights(self, store=False, key=None):
        if key is None:
            self._key, key = jax.random.split(self._key)
        w = self._sample_w(key)
        if store:
            self.w = w
        return w

    def forward(self, x, weights_type="mean", force_pallas=False):
        if weights_type == "mean":
            w = self.mu
        elif weights_type == "stored":
            w = self.w
        elif weights_type == "sample":
            w = self.sample_weights(store=False)  # fresh draw (plain JAX)
        else:
            raise ValueError(weights_type)
        return linear_layer_forward(x, w, force_pallas=force_pallas)

    # TODO(synk): fixed_point_updates (pinverse-based posterior update) is a
    # training-time dense-linear-algebra routine, not part of the forward pass;
    # it is left unimplemented here.


if __name__ == "__main__":
    key = jax.random.PRNGKey(0)
    k_layer, k_x, k_x2, k_w2, k_x3, k_w3 = jax.random.split(key, 6)

    dim_in = 32
    batch = 8

    layer = LinearLayerPallas(dim_in, key=k_layer)
    x = jax.random.normal(k_x, (batch, dim_in), dtype=jnp.float32)

    # 1) Force the Pallas kernel at the small demo shape (single-K path).
    out = jax.block_until_ready(layer.forward(x, weights_type="mean",
                                              force_pallas=True))
    ref = x @ layer.mu.T
    assert out.shape == (batch, 1)
    assert jnp.allclose(out, ref, atol=1e-4, rtol=1e-5)

    # 2) Normal layer forward (may use the XLA fast path) for all weight modes.
    out_mean = jax.block_until_ready(layer.forward(x, weights_type="mean"))
    assert jnp.allclose(out_mean, ref, atol=1e-4, rtol=1e-5)
    out_stored = jax.block_until_ready(layer.forward(x, weights_type="stored"))
    assert jnp.allclose(out_stored, x @ layer.w.T, atol=1e-4, rtol=1e-5)
    out_sample = jax.block_until_ready(layer.forward(x, weights_type="sample"))
    assert out_sample.shape == (batch, 1)

    # 3) Exercise the K-tiled accumulator path + row tiling at small shapes by
    #    shrinking the tile caps / VMEM target.
    x2 = jax.random.normal(k_x2, (256, 512), dtype=jnp.float32)
    w2 = jax.random.normal(k_w2, (1, 512), dtype=jnp.float32)
    out2 = jax.block_until_ready(
        linear_layer_forward(x2, w2, force_pallas=True,
                             tk_cap=128, vmem_target=1 << 16))
    assert jnp.allclose(out2, x2 @ w2.T, atol=1e-3, rtol=1e-5)

    # 4) Unaligned shapes (exercise the minimal alignment padding).
    x3 = jax.random.normal(k_x3, (13, 50), dtype=jnp.float32)
    w3 = jax.random.normal(k_w3, (1, 50), dtype=jnp.float32)
    out3 = jax.block_until_ready(
        linear_layer_forward(x3, w3, force_pallas=True))
    assert out3.shape == (13, 1)
    assert jnp.allclose(out3, x3 @ w3.T, atol=1e-4, rtol=1e-5)

    print("KERNEL_OK")
</pallas_src>

<mosaic_0001>
module attributes {stable_mosaic.version = 11 : i64} {
  func.func @_gemv_single_kernel(%arg0: i32, %arg1: memref<8x128xf32, #tpu.memory_space<vmem>>, %arg2: memref<1x128xf32, #tpu.memory_space<vmem>>, %arg3: memref<1x8xf32, #tpu.memory_space<vmem>>) attributes {dimension_semantics = [#tpu.dimension_semantics<parallel>], iteration_bounds = array<i64: 1>, scalar_prefetch = 0 : i64, scratch_operands = 0 : i64, tpu.core_type = #tpu.core_type<tc>, window_params = [{transform_indices = @transform_0, window_bounds = array<i64: 8, 128>}, {pipeline_mode = #tpu.pipeline_mode<synchronous>, transform_indices = @transform_1, window_bounds = array<i64: 1, 128>}, {transform_indices = @transform_2, window_bounds = array<i64: 1, 8>}]} {
    %c0 = arith.constant 0 : index
    %c0_0 = arith.constant 0 : index
    %0 = vector.load %arg2[%c0, %c0_0] : memref<1x128xf32, #tpu.memory_space<vmem>>, vector<1x128xf32>
    %c0_1 = arith.constant 0 : index
    %c0_2 = arith.constant 0 : index
    %1 = vector.load %arg1[%c0_1, %c0_2] : memref<8x128xf32, #tpu.memory_space<vmem>>, vector<8x128xf32>
    %cst = arith.constant dense<0.000000e+00> : vector<1x8xf32>
    %2 = tpu.matmul %0, %1, %cst {dimension_numbers = #tpu.dot_dimension_numbers<[1], [1], [0], [0], [0, 0, 1, 0], [], []>} : vector<1x128xf32>, vector<8x128xf32>, vector<1x8xf32> -> vector<1x8xf32>
    %c0_3 = arith.constant 0 : index
    %c0_4 = arith.constant 0 : index
    %3 = vector.load %arg3[%c0_3, %c0_4] : memref<1x8xf32, #tpu.memory_space<vmem>>, vector<1x8xf32>
    tpu.vector_store %arg3[%c0_3, %c0_4], %2 {strides = array<i32>} : memref<1x8xf32, #tpu.memory_space<vmem>>, vector<1x8xf32>,
    return
  }
  func.func @transform_0(%arg0: i32) -> (i32, i32) {
    %c0_i32 = arith.constant 0 : i32
    %c0_i32_0 = arith.constant 0 : i32
    return %arg0, %c0_i32 : i32, i32
  }
  func.func @transform_1(%arg0: i32) -> (i32, i32) {
    %c0_i32 = arith.constant 0 : i32
    %c0_i32_0 = arith.constant 0 : i32
    %c0_i32_1 = arith.constant 0 : i32
    return %c0_i32, %c0_i32_0 : i32, i32
  }
  func.func @transform_2(%arg0: i32) -> (i32, i32) {
    %c0_i32 = arith.constant 0 : i32
    %c0_i32_0 = arith.constant 0 : i32
    return %c0_i32, %arg0 : i32, i32
  }
}

</mosaic_0001>

<bundles_post_ra>
// kernel: tpu_custom_call.1
= control target key start
LH: loop header
LB: loop body
LE: loop exit
PB: predicated region body
PF: predicated region fallthrough
CT: control target
= control target key end

     0   :  { %7 = vsyncpa [#allocation3], 0  ;;  %s218_s0 = inlined_call_operand.hbm [shape: f32[8,128], index: 0, kind: input, shape index: {}]   ;;  %s219_s1 = inlined_call_operand.vmem [shape: f32[1,128], index: 1, kind: input, shape index: {}]   ;;  %s220_s2 = inlined_call_operand.hbm [shape: f32[1,8], index: 2, kind: output, shape index: {}]  }
   0x1   :  { %8 = vsyncpa [#allocation4], 0  ;;  %s172_s9 = smov [#allocation2]   ;;  %s124_s13 = scalar_lea.hbm %s218_s0, 128 }
   0x2   :  { %s15_s10 = sshll.u32 %s172_s9, 4  ;;  %p125_p0 = scmp.ne.s32.totalorder %s218_s0, %s124_s13  ;;  %s16_s10 = int_to_ptr.vmem [resolvable:$true] %s15_s10 }
   0x3   :  { %p128_p1 = scmp.lt.u32.totalorder %s124_s13, %s218_s0 }
   0x5   :  { %p130_p2 = pnand %p128_p1, %p125_p0 }
   0x7   :  { %133 = shalt.err (!%p130_p2)
}
   0x8   :  { %s134_s18 = scalar_lea.vmem %s16_s10, 128  ;;  %p139_p4 = scmp.lt.s32.totalorder %s16_s10, %s16_s10 }
   0x9   :  { %p135_p3 = scmp.ne.s32.totalorder %s16_s10, %s134_s18  ;;  %p140_p5 = scmp.lt.s32.totalorder %s134_s18, %s134_s18 }
   0xb   :  { %p141_p6 = por %p140_p5, %p139_p4 }
   0xd   :  { %p142_p7 = pnand %p141_p6, %p135_p3 }
   0xf   :  { %145 = shalt.err (!%p142_p7)
}
  0x10   :  { %18 = dma.hbm_to_vmem [thread:$0]  %s218_s0, 128, %s16_s10, [#allocation3]  }
  0x11   :  { %168 = dma.done.wait [#allocation3], 128  }
  0x12   :  { %169 = vsyncadd [#allocation3], 4294967168  ;;  %v173_v0 = vmov 0.0   ;;  %vm174_vm0 = vmmov 0   ;;  %v25_v1 = vld [vmem:[#allocation2] sm:$0xff]  ;;  %s175_s23 = smov [#allocation5]  }
  0x13   :  { %115 = vmatprep.subr.mxu0 %v173_v0  ;;  %117 = vmatprep.mubr.msk.f32.mxu0 %vm174_vm0, %v173_v0  ;;  %v24_v2 = vld [vmem:[%s219_s1] sm:$0x1]  ;;  %s104_s24 = sshll.u32 %s175_s23, 4  ;;  %vm96_vm1 = vcmask 57344   ;;  %s105_s24 = int_to_ptr.vmem [resolvable:$true] %s104_s24 }
  0x14   :  { %116 = vmatpush3.xpose.msra.mxu0 %v25_v1  ;;  %s146_s0 = scalar_lea.vmem %s105_s24, 16  ;;  %s150_s25 = scalar_lea.vmem %s105_s24, 32 }
  0x15   :  { %p147_p8 = scmp.ne.s32.totalorder %s105_s24, %s146_s0  ;;  %p151_p9 = scmp.lt.s32.totalorder %s105_s24, %s105_s24 }
  0x16   :  { %p152_p10 = scmp.lt.s32.totalorder %s150_s25, %s146_s0 }
  0x17   :  { %118 = vmatmul.mubr.f32.vlgmr.msra.gmra.mrb[0].mxu0 %v24_v2 }
  0x18   :  { %p153_p11 = por %p152_p10, %p151_p9 }
  0x1a   :  { %p154_p12 = pnand %p153_p11, %p147_p8 }
  0xea   :  { %v92_v3 = vpop.f32.mrb[0].mxu0 }
  0xeb   :  { %v119_v4 = vpop.f32.mrb[1].mxu0  ;;  %97 = vst.msk [vmem:[#allocation5] sm:$0x1] %vm96_vm1, %v92_v3 }
  0xec   :  { %157 = shalt.err (!%p154_p12)
}
  0xed   :  { %s158_s1 = scalar_lea.hbm %s220_s2, 16 }
  0xee   :  { %p159_p13 = scmp.ne.s32.totalorder %s220_s2, %s158_s1  ;;  %p162_p0 = scmp.lt.u32.totalorder %s158_s1, %s220_s2 }
  0xf0   :  { %p164_p1 = pnand %p162_p0, %p159_p13 }
  0xf2   :  { %167 = shalt.err (!%p164_p1)
}
  0xf3   :  { %107 = dma.vmem_to_hbm [thread:$0]  %s105_s24, 16, %s220_s2, [#allocation4]  }
  0xf4   :  { %170 = dma.done.wait [#allocation4], 16  }
  0xf5   :  { %171 = vsyncadd [#allocation4], 4294967280 }
  0xf6   :  { %111 = vsyncpa [#allocation3], 1 }
  0xf7   :  { %112 = vsyncpa [#allocation4], 1 }

</bundles_post_ra>
